<compile_context>
chip_gen: v7x
topology: tpu7x:2x2x1
jax: 0.10.0
libtpu: 0.0.40
codegen_flags: <defaults>
</compile_context>

<pallas_src>
import functools
import math

import jax
import jax.numpy as jnp
from jax import lax
from jax.experimental import pallas as pl
from jax.experimental.pallas import tpu as pltpu

_LOG_LO = math.log(1e-8)
_LOG_HI = math.log(1.0 - 1e-8)


def _focal_loss_kernel(logit_ref, tgt_ref, cw_ref, out_ref, *,
                       gamma, n_classes, height, tile_h, accumulate):
    j = pl.program_id(1)

    logits = logit_ref[0].astype(jnp.float32)      # (C, tile_h, W)
    tgt = tgt_ref[0]                               # (tile_h, W) int32

    # log-softmax statistics over the class axis (leading axis -> elementwise
    # across vregs, no cross-lane reduce).
    m = jnp.max(logits, axis=0)                    # (tile_h, W)
    sumexp = jnp.sum(jnp.exp(logits - m[None]), axis=0)
    lse = jnp.log(sumexp)

    # One-hot gather of the target logit and its class weight, unrolled over
    # the small static class count (class weights are scalars in SMEM).
    x_t = jnp.zeros_like(m)
    w_t = jnp.zeros_like(m)
    for c in range(n_classes):
        mask = tgt == c
        x_t = jnp.where(mask, logits[c], x_t)
        w_t = jnp.where(mask, cw_ref[c], w_t)

    # clamp(p, 1e-8, 1-1e-8) == exp(clamp(log p, log 1e-8, log(1-1e-8)))
    logp = jnp.clip((x_t - m) - lse, _LOG_LO, _LOG_HI)
    p = jnp.exp(logp)
    omp = 1.0 - p
    if gamma == 2:
        focal = omp * omp
    elif float(gamma) == int(gamma) and gamma >= 0:
        focal = lax.integer_pow(omp, int(gamma))
    else:
        focal = jnp.power(omp, float(gamma))
    loss = -(w_t * focal * logp)                   # (tile_h, W)

    if height % tile_h:                            # only if H not tile-aligned
        row = lax.broadcasted_iota(jnp.int32, loss.shape, 0) + j * tile_h
        loss = jnp.where(row < height, loss, 0.0)

    if accumulate:
        @pl.when(j == 0)
        def _():
            out_ref[...] = jnp.zeros_like(out_ref)
        out_ref[0] += loss
    else:
        out_ref[0] = loss


def _vmem_capacity_bytes():
    try:
        return int(pltpu.get_tpu_info().vmem_capacity_bytes)
    except Exception:
        return 64 << 20      # conservative default: v7x per-TensorCore VMEM


def _pick_tile_h(H, bytes_per_h_row, vmem_cap):
    budget = vmem_cap // 2   # keep ~half of VMEM as pipeline/compiler headroom
    rows = max(8, budget // max(bytes_per_h_row, 1))
    if rows >= H:
        return H
    return max(8, (rows // 8) * 8)


def focal_loss_2d(logit, target, class_weight=None, *, gamma=2,
                  size_average=True):
    """Softmax focal loss.  logit: (B, C, H, W); target: (B, H, W) int.

    size_average=True  -> scalar mean loss (matches PyTorch FocalLoss2d).
    size_average=False -> per-element losses of shape (B*H*W, 1).
    """
    B, C, H, W = logit.shape
    N = B * H * W

    target = target.reshape(B, H, W).astype(jnp.int32)
    if class_weight is None:
        cw = jnp.ones((C,), dtype=jnp.float32)
    else:
        cw = jnp.asarray(class_weight, dtype=jnp.float32).reshape(C)

    in_itemsize = jnp.dtype(logit.dtype).itemsize
    # per H-row VMEM cost: double-buffered logits + target blocks, plus the
    # (possibly double-buffered) f32 output block.
    bytes_per_h_row = 2 * (C * W * in_itemsize + W * 4) + 2 * (W * 4)
    vmem_cap = _vmem_capacity_bytes()
    tile_h = _pick_tile_h(H, bytes_per_h_row, vmem_cap)
    n_ht = -(-H // tile_h)
    vmem_limit = max(32 << 20, min(vmem_cap - (8 << 20), 112 << 20))

    kernel = functools.partial(
        _focal_loss_kernel, gamma=gamma, n_classes=C, height=H,
        tile_h=tile_h, accumulate=size_average)

    in_specs = [
        pl.BlockSpec((1, C, tile_h, W), lambda b, j: (b, 0, j, 0)),
        pl.BlockSpec((1, tile_h, W), lambda b, j: (b, j, 0)),
        pl.BlockSpec(memory_space=pltpu.MemorySpace.SMEM),
    ]
    if size_average:
        out_shape = jax.ShapeDtypeStruct((B, tile_h, W), jnp.float32)
        out_specs = pl.BlockSpec((1, tile_h, W), lambda b, j: (b, 0, 0))
        dims = ("parallel", "arbitrary")
    else:
        out_shape = jax.ShapeDtypeStruct((B, n_ht * tile_h, W), jnp.float32)
        out_specs = pl.BlockSpec((1, tile_h, W), lambda b, j: (b, j, 0))
        dims = ("parallel", "parallel")

    out_elems = out_shape.shape[0] * out_shape.shape[1] * out_shape.shape[2]
    cost = pl.CostEstimate(
        flops=10 * B * C * H * W + 12 * B * H * W,
        transcendentals=B * C * H * W + 2 * B * H * W,
        bytes_accessed=(B * C * H * W * in_itemsize + B * H * W * 4
                        + C * 4 + out_elems * 4))

    out = pl.pallas_call(
        kernel,
        out_shape=out_shape,
        grid_spec=pltpu.PrefetchScalarGridSpec(
            num_scalar_prefetch=0,
            grid=(B, n_ht),
            in_specs=in_specs,
            out_specs=out_specs,
        ),
        compiler_params=pltpu.CompilerParams(
            dimension_semantics=dims,
            vmem_limit_bytes=vmem_limit),
        cost_estimate=cost,
    )(logit, target, cw)

    if size_average:
        return jnp.sum(out) / N
    return out[:, :H, :].reshape(N, 1)


def _reference_focal_loss(logit, target, class_weight=None, gamma=2,
                          size_average=True):
    B, C, H, W = logit.shape
    lg = jnp.transpose(logit, (0, 2, 3, 1)).reshape(-1, C).astype(jnp.float32)
    tg = target.reshape(-1)
    prob = jax.nn.softmax(lg, axis=1)
    p = jnp.clip(prob[jnp.arange(lg.shape[0]), tg], 1e-8, 1 - 1e-8)
    if class_weight is None:
        w = jnp.ones_like(p)
    else:
        w = jnp.asarray(class_weight, jnp.float32)[tg]
    loss = -w * ((1 - p) ** gamma) * jnp.log(p)
    return jnp.mean(loss) if size_average else loss


# TODO(synk): the `type='sigmoid'` branch of the PyTorch module is not
# implemented; only the default softmax path is translated.

if __name__ == "__main__":
    key = jax.random.PRNGKey(0)
    k1, k2 = jax.random.split(key)
    B, C, H, W = 2, 4, 16, 16
    logit = jax.random.normal(k1, (B, C, H, W), dtype=jnp.float32)
    target = jax.random.randint(k2, (B, H, W), 0, C, dtype=jnp.int32)

    # mean-reduced loss, default (uniform) class weights
    out = focal_loss_2d(logit, target, gamma=2, size_average=True)
    out = jax.block_until_ready(out)
    ref = _reference_focal_loss(logit, target, gamma=2, size_average=True)
    assert jnp.allclose(out, ref, rtol=1e-5, atol=1e-6), (out, ref)

    # explicit class weights
    cw = [0.5, 1.0, 2.0, 1.5]
    out_w = focal_loss_2d(logit, target, class_weight=cw, gamma=2,
                          size_average=True)
    out_w = jax.block_until_ready(out_w)
    ref_w = _reference_focal_loss(logit, target, class_weight=cw, gamma=2,
                                  size_average=True)
    assert jnp.allclose(out_w, ref_w, rtol=1e-5, atol=1e-6), (out_w, ref_w)

    # per-element (size_average=False) path
    out_map = focal_loss_2d(logit, target, gamma=2, size_average=False)
    out_map = jax.block_until_ready(out_map)
    ref_map = _reference_focal_loss(logit, target, gamma=2,
                                    size_average=False)
    assert out_map.shape == (B * H * W, 1)
    assert jnp.allclose(out_map[:, 0], ref_map, rtol=1e-5, atol=1e-6)

    print("KERNEL_OK")
</pallas_src>

<mosaic_0001>
module attributes {stable_mosaic.version = 11 : i64} {
  func.func @_focal_loss_kernel(%arg0: i32, %arg1: i32, %arg2: memref<1x4x16x16xf32, #tpu.memory_space<vmem>>, %arg3: memref<1x16x16xi32, #tpu.memory_space<vmem>>, %arg4: memref<4xf32, #tpu.memory_space<smem>>, %arg5: memref<1x16x16xf32, #tpu.memory_space<vmem>>) attributes {dimension_semantics = [#tpu.dimension_semantics<parallel>, #tpu.dimension_semantics<arbitrary>], iteration_bounds = array<i64: 2, 1>, scalar_prefetch = 0 : i64, scratch_operands = 0 : i64, tpu.core_type = #tpu.core_type<tc>, window_params = [{transform_indices = @transform_0, window_bounds = array<i64: 1, 4, 16, 16>}, {transform_indices = @transform_1, window_bounds = array<i64: 1, 16, 16>}, {transform_indices = @transform_2, window_bounds = array<i64: 4>}, {transform_indices = @transform_3, window_bounds = array<i64: 1, 16, 16>}]} {
    %c0 = arith.constant 0 : index
    %c0_0 = arith.constant 0 : index
    %c0_1 = arith.constant 0 : index
    %c0_2 = arith.constant 0 : index
    %0 = vector.load %arg2[%c0, %c0_0, %c0_1, %c0_2] : memref<1x4x16x16xf32, #tpu.memory_space<vmem>>, vector<1x4x16x16xf32>
    %1 = vector.shape_cast %0 : vector<1x4x16x16xf32> to vector<4x16x16xf32>
    %c0_3 = arith.constant 0 : index
    %c0_4 = arith.constant 0 : index
    %c0_5 = arith.constant 0 : index
    %2 = vector.load %arg3[%c0_3, %c0_4, %c0_5] : memref<1x16x16xi32, #tpu.memory_space<vmem>>, vector<1x16x16xi32>
    %3 = vector.shape_cast %2 : vector<1x16x16xi32> to vector<16x16xi32>
    %cst = arith.constant dense<0xFF800000> : vector<16x16xf32>
    %4 = vector.multi_reduction <maximumf>, %1, %cst [0] : vector<4x16x16xf32> to vector<16x16xf32>
    %5 = vector.shape_cast %4 : vector<16x16xf32> to vector<1x16x16xf32>
    %6 = vector.broadcast %5 : vector<1x16x16xf32> to vector<4x16x16xf32>
    %7 = arith.subf %1, %6 : vector<4x16x16xf32>
    %8 = math.exp %7 : vector<4x16x16xf32>
    %cst_6 = arith.constant dense<0.000000e+00> : vector<16x16xf32>
    %9 = vector.multi_reduction <add>, %8, %cst_6 [0] : vector<4x16x16xf32> to vector<16x16xf32>
    %10 = math.log %9 : vector<16x16xf32>
    %cst_7 = arith.constant 0.000000e+00 : f32
    %11 = vector.broadcast %cst_7 : f32 to vector<16x16xf32>
    %cst_8 = arith.constant 0.000000e+00 : f32
    %12 = vector.broadcast %cst_8 : f32 to vector<16x16xf32>
    %c0_i32 = arith.constant 0 : i32
    %13 = vector.broadcast %c0_i32 : i32 to vector<16x16xi32>
    %14 = arith.cmpi eq, %3, %13 : vector<16x16xi32>
    %15 = vector.extract_strided_slice %1 {offsets = [0, 0, 0], sizes = [1, 16, 16], strides = [1, 1, 1]} : vector<4x16x16xf32> to vector<1x16x16xf32>
    %16 = vector.shape_cast %15 : vector<1x16x16xf32> to vector<16x16xf32>
    %17 = arith.select %14, %16, %11 : vector<16x16xi1>, vector<16x16xf32>
    %c0_9 = arith.constant 0 : index
    %18 = memref.load %arg4[%c0_9] : memref<4xf32, #tpu.memory_space<smem>>
    %19 = vector.broadcast %18 : f32 to vector<16x16xf32>
    %20 = arith.select %14, %19, %12 : vector<16x16xi1>, vector<16x16xf32>
    %c1_i32 = arith.constant 1 : i32
    %21 = vector.broadcast %c1_i32 : i32 to vector<16x16xi32>
    %22 = arith.cmpi eq, %3, %21 : vector<16x16xi32>
    %23 = vector.extract_strided_slice %1 {offsets = [1, 0, 0], sizes = [1, 16, 16], strides = [1, 1, 1]} : vector<4x16x16xf32> to vector<1x16x16xf32>
    %24 = vector.shape_cast %23 : vector<1x16x16xf32> to vector<16x16xf32>
    %25 = arith.select %22, %24, %17 : vector<16x16xi1>, vector<16x16xf32>
    %c1 = arith.constant 1 : index
    %26 = memref.load %arg4[%c1] : memref<4xf32, #tpu.memory_space<smem>>
    %27 = vector.broadcast %26 : f32 to vector<16x16xf32>
    %28 = arith.select %22, %27, %20 : vector<16x16xi1>, vector<16x16xf32>
    %c2_i32 = arith.constant 2 : i32
    %29 = vector.broadcast %c2_i32 : i32 to vector<16x16xi32>
    %30 = arith.cmpi eq, %3, %29 : vector<16x16xi32>
    %31 = vector.extract_strided_slice %1 {offsets = [2, 0, 0], sizes = [1, 16, 16], strides = [1, 1, 1]} : vector<4x16x16xf32> to vector<1x16x16xf32>
    %32 = vector.shape_cast %31 : vector<1x16x16xf32> to vector<16x16xf32>
    %33 = arith.select %30, %32, %25 : vector<16x16xi1>, vector<16x16xf32>
    %c2 = arith.constant 2 : index
    %34 = memref.load %arg4[%c2] : memref<4xf32, #tpu.memory_space<smem>>
    %35 = vector.broadcast %34 : f32 to vector<16x16xf32>
    %36 = arith.select %30, %35, %28 : vector<16x16xi1>, vector<16x16xf32>
    %c3_i32 = arith.constant 3 : i32
    %37 = vector.broadcast %c3_i32 : i32 to vector<16x16xi32>
    %38 = arith.cmpi eq, %3, %37 : vector<16x16xi32>
    %39 = vector.extract_strided_slice %1 {offsets = [3, 0, 0], sizes = [1, 16, 16], strides = [1, 1, 1]} : vector<4x16x16xf32> to vector<1x16x16xf32>
    %40 = vector.shape_cast %39 : vector<1x16x16xf32> to vector<16x16xf32>
    %41 = arith.select %38, %40, %33 : vector<16x16xi1>, vector<16x16xf32>
    %c3 = arith.constant 3 : index
    %42 = memref.load %arg4[%c3] : memref<4xf32, #tpu.memory_space<smem>>
    %43 = vector.broadcast %42 : f32 to vector<16x16xf32>
    %44 = arith.select %38, %43, %36 : vector<16x16xi1>, vector<16x16xf32>
    %45 = arith.subf %41, %4 : vector<16x16xf32>
    %46 = arith.subf %45, %10 : vector<16x16xf32>
    %cst_10 = arith.constant -18.420681 : f32
    %cst_11 = arith.constant -9.99999993E-9 : f32
    %47 = vector.broadcast %cst_10 : f32 to vector<16x16xf32>
    %48 = arith.maximumf %47, %46 : vector<16x16xf32>
    %49 = vector.broadcast %cst_11 : f32 to vector<16x16xf32>
    %50 = arith.minimumf %49, %48 : vector<16x16xf32>
    %51 = math.exp %50 : vector<16x16xf32>
    %cst_12 = arith.constant 1.000000e+00 : f32
    %52 = vector.broadcast %cst_12 : f32 to vector<16x16xf32>
    %53 = arith.subf %52, %51 : vector<16x16xf32>
    %54 = arith.mulf %53, %53 : vector<16x16xf32>
    %55 = arith.mulf %44, %54 : vector<16x16xf32>
    %56 = arith.mulf %55, %50 : vector<16x16xf32>
    %cst_13 = arith.constant 0.000000e+00 : f32
    %57 = vector.broadcast %cst_13 : f32 to vector<16x16xf32>
    %58 = arith.subf %57, %56 : vector<16x16xf32>
    %c0_i32_14 = arith.constant 0 : i32
    %59 = arith.cmpi eq, %arg1, %c0_i32_14 : i32
    %60 = arith.extui %59 : i1 to i32
    %c0_i32_15 = arith.constant 0 : i32
    %61 = arith.cmpi ne, %60, %c0_i32_15 : i32
    scf.if %61 {
      %cst_22 = arith.constant 0.000000e+00 : f32
      %68 = vector.broadcast %cst_22 : f32 to vector<1x16x16xf32>
      %c0_23 = arith.constant 0 : index
      %c0_24 = arith.constant 0 : index
      %c0_25 = arith.constant 0 : index
      %69 = vector.load %arg5[%c0_23, %c0_24, %c0_25] : memref<1x16x16xf32, #tpu.memory_space<vmem>>, vector<1x16x16xf32>
      tpu.vector_store %arg5[%c0_23, %c0_24, %c0_25], %68 {strides = array<i32>} : memref<1x16x16xf32, #tpu.memory_space<vmem>>, vector<1x16x16xf32>,
    } else {
    }
    %c0_16 = arith.constant 0 : index
    %c0_17 = arith.constant 0 : index
    %c0_18 = arith.constant 0 : index
    %62 = vector.load %arg5[%c0_16, %c0_17, %c0_18] : memref<1x16x16xf32, #tpu.memory_space<vmem>>, vector<1x16x16xf32>
    %63 = vector.shape_cast %62 : vector<1x16x16xf32> to vector<16x16xf32>
    %64 = arith.addf %63, %58 : vector<16x16xf32>
    %c0_19 = arith.constant 0 : index
    %c0_20 = arith.constant 0 : index
    %c0_21 = arith.constant 0 : index
    %65 = vector.load %arg5[%c0_19, %c0_20, %c0_21] : memref<1x16x16xf32, #tpu.memory_space<vmem>>, vector<1x16x16xf32>
    %66 = vector.shape_cast %65 : vector<1x16x16xf32> to vector<16x16xf32>
    %67 = vector.shape_cast %64 : vector<16x16xf32> to vector<1x16x16xf32>
    tpu.vector_store %arg5[%c0_19, %c0_20, %c0_21], %67 {strides = array<i32>} : memref<1x16x16xf32, #tpu.memory_space<vmem>>, vector<1x16x16xf32>,
    return
  }
  func.func @transform_0(%arg0: i32, %arg1: i32) -> (i32, i32, i32, i32) {
    %c0_i32 = arith.constant 0 : i32
    %c0_i32_0 = arith.constant 0 : i32
    %c0_i32_1 = arith.constant 0 : i32
    return %arg0, %c0_i32, %arg1, %c0_i32_0 : i32, i32, i32, i32
  }
  func.func @transform_1(%arg0: i32, %arg1: i32) -> (i32, i32, i32) {
    %c0_i32 = arith.constant 0 : i32
    %c0_i32_0 = arith.constant 0 : i32
    return %arg0, %arg1, %c0_i32 : i32, i32, i32
  }
  func.func @transform_2(%arg0: i32, %arg1: i32) -> i32 {
    %c0_i32 = arith.constant 0 : i32
    %c0_i32_0 = arith.constant 0 : i32
    return %c0_i32 : i32
  }
  func.func @transform_3(%arg0: i32, %arg1: i32) -> (i32, i32, i32) {
    %c0_i32 = arith.constant 0 : i32
    %c0_i32_0 = arith.constant 0 : i32
    %c0_i32_1 = arith.constant 0 : i32
    return %arg0, %c0_i32, %c0_i32_0 : i32, i32, i32
  }
}

</mosaic_0001>

<bundles_post_ra>
// kernel: tpu_custom_call.1
= control target key start
LH: loop header
LB: loop body
LE: loop exit
PB: predicated region body
PF: predicated region fallthrough
CT: control target
= control target key end

     0   :  { %s1252_s0 = inlined_call_operand.hbm [shape: f32[2,4,16,16], index: 0, kind: input, shape index: {}]   ;;  %s1253_s1 = inlined_call_operand.hbm [shape: s32[2,16,16], index: 1, kind: input, shape index: {}]   ;;  %s1254_s2 = inlined_call_operand.vmem [shape: f32[4], index: 2, kind: input, shape index: {}]   ;;  %s1255_s3 = inlined_call_operand.hbm [shape: f32[2,16,16], index: 3, kind: output, shape index: {}]  }
   0x1   :  { %1260 = sst [smem:[#allocation14_spill]] %s1252_s0 }
   0x2   :  { %1261 = sst [smem:[#allocation15_spill]] %s1254_s2 }
   0x3   :  { %8 = vsyncpa [#allocation3], 0 }
   0x4   :  { %10 = vsyncpa [#allocation3 + $0x1], 0 }
   0x5   :  { %11 = vsyncpa [#allocation7], 0 }
   0x6   :  { %13 = vsyncpa [#allocation7 + $0x1], 0 }
   0x7   :  { %14 = vsyncpa [#allocation5], 0 }
   0x8   :  { %15 = vsyncpa [#allocation4], 0 }
   0x9   :  { %17 = vsyncpa [#allocation4 + $0x1], 0  ;;  %s864_s12 = smov 0   ;;  %s866_s13 = smov 0  }
   0xa   :  { %s868_s14 = smov 0   ;;  %s870_s15 = smov 0  }
   0xb   :  { %s872_s16 = smov 0   ;;  %s874_s17 = smov 0  }
   0xc LB: > { %s534_s18 = sadd.s32 4294967295, %s833_s17   ;;  %s535_s19 = sadd.s32 4294967294, %s833_s17   ;;  %s833_s17 = sphi %s874_s17, %s23_s17   ;;  %s829_s16 = sphi %s872_s16, %s1282_s16   ;;  %s825_s15 = sphi %s870_s15, %s1281_s15   ;;  %s821_s14 = sphi %s868_s14, %s1280_s14   ;;  %s817_s13 = sphi %s866_s13, %s1279_s13   ;;  %s813_s12 = sphi %s864_s12, %s1278_s12  }
   0xd   : > { %s44_s20 = sadd.s32 1, %s821_s14  ;;  %p51_p0 = scmp.ne.s32.totalorder %s821_s14, %s817_s13 }
   0xe   : > { %p52_p1 = scmp.eq.s32.totalorder %s833_s17, 0  ;;  %p57_p2 = scmp.ne.s32.totalorder %s817_s13, %s813_s12 }
   0xf   : > { %p902_p3 = scmp.eq.s32.totalorder %s534_s18, 0  ;;  %p130_p4 = scmp.eq.s32.totalorder %s534_s18, 1 }
  0x10   : > { %p906_p5 = por %p52_p1, %p51_p0  ;;  %p136_p6 = scmp.eq.s32.totalorder %s535_s19, 1 }
  0x11   : > { %s1262_s21 = scalar_select %p902_p3, 1, 0 }
  0x12   : > { %p912_p7 = por %p902_p3, %p57_p2  ;;  %p916_p8 = por %p130_p4, %p51_p0 }
  0x13   : > { %p920_p9 = por %p136_p6, %p57_p2  ;;  %p536_p10 = scmp.ge.s32.totalorder %s833_s17, 1 }
  0x14   : > { %s1264_s23 = scalar_select %p912_p7, 1, 0 }
  0x15   : > { %s1265_s24 = scalar_select %p916_p8, 1, 0 }
  0x16   : > { %s1266_s25 = scalar_select %p920_p9, 1, 0 }
  0x17   : > { %p143_p11 = scmp.lt.s32.totalorder %s833_s17, 3  ;;  %s1267_s2 = sld [smem:[#allocation15_spill]] }
  0x18   : > { %p587_p0 = scmp.lt.s32.totalorder %s833_s17, 2  ;;  %s35_s5 = sadd.s32 1, %s829_s16 }
  0x19   : > { %p929_p12 = pnand %p536_p10, %p143_p11  ;;  %p950_p6 = scmp.ge.s32.totalorder %s35_s5, 2 }
  0x1a   : > { %p939_p2 = pnand %p587_p0, %p906_p5  ;;  %s955_s7 = sand.u32 1, %s821_s14  }
  0x1b   : > { %p571_p1 = pneg %p929_p12 }
  0x1d   : > { %s156_s28 = sshll.u32 %s1267_s2, 4  ;;  %p945_p4 = pnand %p571_p1, %p902_p3  ;;  %s157_s28 = int_to_ptr.vmem [resolvable:$true] %s156_s28 }
  0x1e   : > { %s668_s8 = scalar_lea.vmem %s157_s28, 16  ;;  %p676_p13 = scmp.lt.s32.totalorder %s157_s28, %s157_s28 }
  0x1f   : > { %p669_p10 = scmp.ne.s32.totalorder %s157_s28, %s668_s8  ;;  %p670_p5 = pneg %p945_p4 }
  0x20   : > { %p677_p9 = scmp.lt.s32.totalorder %s668_s8, %s668_s8 }
  0x21   : > { %p671_p11 = pnand %p670_p5, %p669_p10 }
  0x22   : > { %p678_p1 = por %p677_p9, %p676_p13 }
  0x23   : > { %p672_p0 = pneg %p671_p11 }
  0x25   : > { %p679_p8 = pnand %p678_p1, %p672_p0 }
  0x27   : > { %682 = shalt.err (!%p679_p8)
}
  0x28   : > { %s835_s9 = smov [#allocation8]   ;;  %s1284_s5 = smov (%p950_p6, %s35_s5), 0 }
  0x29   : > { %574 = dma.vmem_to_smem (!%p945_p4), %s157_s28, 16, %s835_s9, [#allocation5]  }
  0x2a   : > { %s539_s10 = sshll.u32 %s955_s7, 6  ;;  %s39_s11 = ssub.s32 %s829_s16, %s1284_s5 }
  0x2b   : > { %p42_p8 = scmp.eq.s32.totalorder %s39_s11, 0  ;;  %s558_s18 = sshll.u32 %s829_s16, 10 }
  0x2c   : > { %s1272_s0 = sld [smem:[#allocation14_spill]]  ;;  %s171_s27 = scalar_lea.vmem [#allocation2], %s539_s10 }
  0x2d   : > { %s180_s4 = sshll.u32 %s171_s27, 4  ;;  %s168_s6 = scalar_lea.sflag [#allocation3], %s955_s7  ;;  %s979_s4 = int_to_ptr.vmem [resolvable:$true] %s180_s4 }
  0x2e   : > { %s977_s28 = scalar_select %p42_p8, %s821_s14, %s44_s20  }
  0x2f   : > { %p685_p13 = pneg %p939_p2 }
  0x32   : > { %s972_s26 = scalar_lea.hbm %s1272_s0, %s558_s18  ;;  %s688_s18 = scalar_lea.hbm %s1272_s0, 2048 }
  0x33   : > { %s683_s8 = scalar_lea.hbm %s972_s26, 1024  ;;  %p689_p10 = scmp.lt.u32.totalorder %s972_s26, %s1272_s0 }
  0x34   : > { %p684_p9 = scmp.ne.s32.totalorder %s972_s26, %s683_s8  ;;  %p690_p5 = scmp.lt.u32.totalorder %s688_s18, %s683_s8 }
  0x35   : > { %p692_p0 = scmp.lt.u32.totalorder %s683_s8, %s972_s26 }
  0x36   : > { %p686_p4 = pnand %p685_p13, %p684_p9  ;;  %p691_p11 = por %p690_p5, %p689_p10 }
  0x38   : > { %p687_p6 = pneg %p686_p4  ;;  %p693_p1 = por %p692_p0, %p691_p11 }
  0x3a   : > { %p694_p8 = pnand %p693_p1, %p687_p6 }
  0x3c   : > { %697 = shalt.err (!%p694_p8)
}
  0x3d   : > { %s698_s20 = scalar_lea.vmem %s979_s4, 1024  ;;  %s836_s22 = smov [#allocation2]  }
  0x3e   : > { %p699_p9 = scmp.ne.s32.totalorder %s979_s4, %s698_s20  ;;  %s703_s27 = sshll.u32 %s836_s22, 4  ;;  %s704_s27 = int_to_ptr.vmem [resolvable:$false] %s703_s27 }
  0x3f   : > { %s705_s9 = scalar_lea.vmem %s704_s27, 2048  ;;  %p706_p7 = scmp.lt.s32.totalorder %s979_s4, %s704_s27 }
  0x40   : > { %p701_p4 = pnand %p699_p9, %p685_p13  ;;  %p707_p10 = scmp.lt.s32.totalorder %s705_s9, %s698_s20 }
  0x42   : > { %p702_p3 = pneg %p701_p4  ;;  %p708_p5 = por %p707_p10, %p706_p7 }
  0x44   : > { %p709_p11 = pnand %p708_p5, %p702_p3 }
  0x46   : > { %712 = shalt.err (!%p709_p11)
}
  0x47   : > { %s837_s8 = smov 128   ;;  %s838_s11 = smov 8  }
  0x48   : > { %578 = dma.hbm_to_vmem [thread:$0]  (!%p939_p2), %s972_s26, 1024, %s979_s4, %s168_s6, %s837_s8, %s837_s8, %s838_s11  }
  0x49   : > { %s542_s18 = sshll.u32 %s955_s7, 4  ;;  %s559_s10 = sshll.u32 %s829_s16, 8 }
  0x4a   : > { %s1017_s22 = scalar_lea.hbm %s1253_s1, %s559_s10  ;;  %s194_s27 = scalar_lea.vmem [#allocation6], %s542_s18 }
  0x4b   : > { %s203_s9 = sshll.u32 %s194_s27, 4  ;;  %s191_s0 = scalar_lea.sflag [#allocation7], %s955_s7  ;;  %s1019_s9 = int_to_ptr.vmem [resolvable:$true] %s203_s9 }
  0x4c   : > { %s713_s2 = scalar_lea.hbm %s1017_s22, 256  ;;  %s718_s6 = scalar_lea.hbm %s1253_s1, 512 }
  0x4d   : > { %p714_p3 = scmp.ne.s32.totalorder %s1017_s22, %s713_s2  ;;  %p719_p0 = scmp.lt.u32.totalorder %s1017_s22, %s1253_s1 }
  0x4e   : > { %p720_p1 = scmp.lt.u32.totalorder %s718_s6, %s713_s2  ;;  %p722_p9 = scmp.lt.u32.totalorder %s713_s2, %s1017_s22 }
  0x4f   : > { %p716_p7 = pnand %p714_p3, %p685_p13 }
  0x50   : > { %p721_p8 = por %p720_p1, %p719_p0 }
  0x51   : > { %p717_p6 = pneg %p716_p7 }
  0x52   : > { %p723_p4 = por %p722_p9, %p721_p8 }
  0x54   : > { %p724_p10 = pnand %p723_p4, %p717_p6 }
  0x56   : > { %727 = shalt.err (!%p724_p10)
}
  0x57   : > { %s728_s18 = scalar_lea.vmem %s1019_s9, 256  ;;  %s839_s20 = smov [#allocation6]  }
  0x58   : > { %p729_p5 = scmp.ne.s32.totalorder %s1019_s9, %s728_s18  ;;  %s733_s27 = sshll.u32 %s839_s20, 4  ;;  %s734_s27 = int_to_ptr.vmem [resolvable:$false] %s733_s27 }
  0x59   : > { %s735_s26 = scalar_lea.vmem %s734_s27, 512  ;;  %p736_p7 = scmp.lt.s32.totalorder %s1019_s9, %s734_s27 }
  0x5a   : > { %p731_p11 = pnand %p729_p5, %p685_p13  ;;  %p737_p0 = scmp.lt.s32.totalorder %s735_s26, %s728_s18 }
  0x5c   : > { %p732_p3 = pneg %p731_p11  ;;  %p738_p1 = por %p737_p0, %p736_p7 }
  0x5e   : > { %p739_p8 = pnand %p738_p1, %p732_p3 }
  0x60   : > { %742 = shalt.err (!%p739_p8)
}
  0x61   : > { %581 = dma.hbm_to_vmem [thread:$0]  (!%p939_p2), %s1017_s22, 256, %s1019_s9, %s191_s0, %s837_s8, %s837_s8, %s838_s11  }
  0x62   : > { %215 = sbr.rel (%p929_p12) target bundleno = 207 (0xcf), region = 32  ;;  %s1053_s2 = sand.u32 (!%p929_p12), 1, %s817_s13  }
  0x63   : > { %s546_s4 = sshll.u32 (!%p929_p12), %s1053_s2, 6  ;;  %s218_s6 = scalar_lea.sflag (!%p929_p12), [#allocation3], %s1053_s2 }
  0x64   : > { %s221_s30 = scalar_lea.vmem (!%p929_p12), [#allocation2], %s546_s4  ;;  %p1273_p13 = scmp.ne.s32.totalorder (!%p929_p12), %s1264_s23, 0 }
  0x69   : > { %796 = dma.done.wait (%p1273_p13), %s218_s6, 1024  }
  0x6a   : > { %798 = vsyncadd (%p1273_p13), %s218_s6, 4294966272  ;;  %s547_s0 = sshll.u32 %s1053_s2, 4  ;;  %s227_s29 = scalar_lea.sflag [#allocation7], %s1053_s2 }
  0x6b   : > { %s1063_s7 = scalar_lea.vmem [#allocation6], %s547_s0 }
  0x6c   : > { %800 = dma.done.wait (%p1273_p13), %s227_s29, 256  }
  0x6d   : > { %802 = vsyncadd (%p1273_p13), %s227_s29, 4294967040  ;;  %p1274_p12 = scmp.ne.s32.totalorder %s1262_s21, 0 }
  0x6f   : > { %804 = dma.done.wait (%p1274_p12), [#allocation5], 16  }
  0x70   : > { %806 = vsyncadd (%p1274_p12), [#allocation5], 4294967280 }
  0x71   : > { %239 = sfence }
  0x72   : > { %vm275_vm0 = vcmask 130048   ;;  %v265_v0 = vld [vmem:[%s221_s30] sm:$0xff]  ;;  %v1073_v1 = vld [vmem:[%s221_s30 + $0x10] sm:$0xff]  ;;  %s1077_s8 = scalar_lea.vmem [#allocation9], %s547_s0  ;;  %v840_v3 = vmov 0.0   ;;  %v1092_v10 = vld [vmem:[%s221_s30 + $0x8] sm:$0xff] }
  0x73   : > { %v1075_v2 = vld [vmem:[%s221_s30 + $0x20] sm:$0xff]  ;;  %390 = vst.msk [vmem:[%s1077_s8] sm:$0xff] %vm275_vm0, %v840_v3  ;;  %391 = vst.msk [vmem:[%s1077_s8 + $0x8] sm:$0xff] %vm275_vm0, %v840_v3  ;;  %v1083_v4 = vld [vmem:[%s221_s30 + $0x30] sm:$0xff]  ;;  %v276_v5 = vsel %vm275_vm0, %v265_v0, -inf  ;;  %v277_v6 = vsel %vm275_vm0, %v1073_v1, -inf }
  0x74   : > { %v278_v7 = vsel %vm275_vm0, %v1075_v2, -inf  ;;  %v280_v9 = vsel %vm275_vm0, %v1083_v4, -inf  ;;  %v1094_v11 = vld [vmem:[%s221_s30 + $0x18] sm:$0xff]  ;;  %v1096_v13 = vld [vmem:[%s221_s30 + $0x28] sm:$0xff]  ;;  %v283_v16 = vsel %vm275_vm0, %v1092_v10, -inf  ;;  %v1128_v39 = vld [vmem:[%s1063_s7] sm:$0xff] }
  0x75   : > { %v279_v8 = vmax.f32 %v276_v5, %v278_v7  ;;  %v281_v12 = vmax.f32 %v277_v6, %v280_v9  ;;  %v1098_v14 = vld [vmem:[%s221_s30 + $0x38] sm:$0xff]  ;;  %v284_v17 = vsel %vm275_vm0, %v1094_v11, -inf  ;;  %v285_v18 = vsel %vm275_vm0, %v1096_v13, -inf  ;;  %s336_s21 = sld [smem:[#allocation8]]  ;;  %s550_s23 = sld [smem:[#allocation8 + $0x1]] }
  0x76   : > { %v287_v19 = vsel %vm275_vm0, %v1098_v14, -inf  ;;  %v286_v24 = vmax.f32 %v283_v16, %v285_v18  ;;  %vm332_vm1 = vcmp.eq.s32.totalorder %v1128_v39, 0  ;;  %vm340_vm2 = vcmp.eq.s32.totalorder %v1128_v39, 1  ;;  %v1139_v52 = vld [vmem:[%s1063_s7 + $0x8] sm:$0xff]  ;;  %s551_s11 = sld [smem:[#allocation8 + $0x2]]  ;;  %s552_s22 = sld [smem:[#allocation8 + $0x3]] }
  0x77   : > { %v1100_v15 = vmax.f32 %v279_v8, %v281_v12  ;;  %v288_v25 = vmax.f32 %v284_v17, %v287_v19  ;;  %v334_v50 = vsel %vm332_vm1, %v265_v0, 0.0  ;;  %vm348_vm3 = vcmp.eq.s32.totalorder %v1128_v39, 2  ;;  %s560_s9 = sshll.u32 %s825_s15, 8  ;;  %s412_s10 = sshll.u32 %s1077_s8, 4  ;;  %s1201_s10 = int_to_ptr.vmem [resolvable:$true] %s412_s10 }
  0x78   : > { %v342_v57 = vsel %vm340_vm2, %v1073_v1, %v334_v50  ;;  %vm333_vm4 = vcmp.eq.s32.totalorder %v1139_v52, 0  ;;  %vm356_vm5 = vcmp.eq.s32.totalorder %v1128_v39, 3  ;;  %vm341_vm6 = vcmp.eq.s32.totalorder %v1139_v52, 1  ;;  %s1199_s20 = scalar_lea.hbm %s1255_s3, %s560_s9  ;;  %s399_s27 = scalar_lea.sflag [#allocation4], %s1053_s2 }
  0x79   : > { %v290_v20 = vsub.f32 %v265_v0, %v1100_v15  ;;  %v292_v21 = vsub.f32 %v1073_v1, %v1100_v15  ;;  %v294_v22 = vsub.f32 %v1075_v2, %v1100_v15  ;;  %v296_v23 = vsub.f32 %v1083_v4, %v1100_v15  ;;  %s743_s26 = scalar_lea.vmem %s1201_s10, 256  ;;  %p1275_p6 = scmp.ne.s32.totalorder %s1265_s24, 0 }
  0x7a   : > { %v1117_v30 = vmax.f32 %v286_v24, %v288_v25  ;;  %v350_v0 = vsel %vm348_vm3, %v1075_v2, %v342_v57  ;;  %v335_v1 = vsel %vm333_vm4, %v1092_v10, 0.0  ;;  %vm349_vm7 = vcmp.eq.s32.totalorder %v1139_v52, 2  ;;  %p744_p2 = scmp.ne.s32.totalorder %s1201_s10, %s743_s26  ;;  %s841_s15 = smov [#allocation9]  }
  0x7b   : > { %v298_v26 = vmul.f32 1.442695, %v290_v20  ;;  %v302_v27 = vmul.f32 1.442695, %v292_v21  ;;  %v306_v28 = vmul.f32 1.442695, %v294_v22  ;;  %v358_v5 = vsel %vm356_vm5, %v1083_v4, %v350_v0 }
  0x7c   : > { %v310_v29 = vmul.f32 1.442695, %v296_v23  ;;  %v291_v31 = vsub.f32 %v1092_v10, %v1117_v30  ;;  %v293_v32 = vsub.f32 %v1094_v11, %v1117_v30  ;;  %v295_v33 = vsub.f32 %v1096_v13, %v1117_v30  ;;  %p745_p9 = pnand %p744_p2, %p1275_p6  ;;  %s747_s4 = sshll.u32 %s841_s15, 4  ;;  %s748_s4 = int_to_ptr.vmem [resolvable:$false] %s747_s4 }
  0x7d   : > { %644 = vpow2.f32 %v298_v26  ;;  %v297_v34 = vsub.f32 %v1098_v14, %v1117_v30  ;;  %v343_v6 = vsel %vm341_vm6, %v1094_v11, %v335_v1  ;;  %v364_v2 = vsub.f32 %v358_v5, %v1100_v15  ;;  %s749_s6 = scalar_lea.vmem %s748_s4, 512  ;;  %p750_p10 = scmp.lt.s32.totalorder %s1201_s10, %s748_s4 }
  0x7e   : > { %646 = vpow2.f32 %v302_v27  ;;  %v300_v35 = vmul.f32 1.442695, %v291_v31  ;;  %v304_v36 = vmul.f32 1.442695, %v293_v32  ;;  %v308_v37 = vmul.f32 1.442695, %v295_v33  ;;  %p746_p4 = pneg %p745_p9  ;;  %p751_p5 = scmp.lt.s32.totalorder %s749_s6, %s743_s26 }
  0x7f   : > { %648 = vpow2.f32 %v306_v28  ;;  %v312_v38 = vmul.f32 1.442695, %v297_v34  ;;  %v351_v7 = vsel %vm349_vm7, %v1096_v13, %v343_v6  ;;  %vm357_vm8 = vcmp.eq.s32.totalorder %v1139_v52, 3 }
  0x80   : > { %650 = vpow2.f32 %v310_v29  ;;  %v359_v4 = vsel %vm357_vm8, %v1098_v14, %v351_v7  ;;  %v337_v19 = vstv %s336_s21  ;;  %v345_v22 = vstv %s550_s23  ;;  %p752_p11 = por %p751_p5, %p750_p10 }
  0x81   : > { %652 = vpow2.f32 %v300_v35  ;;  %v365_v11 = vsub.f32 %v359_v4, %v1117_v30  ;;  %v338_v14 = vsel %vm332_vm1, %v337_v19, 0.0  ;;  %v353_v25 = vstv %s551_s11 }
  0x82   : > { %654 = vpow2.f32 %v304_v36  ;;  %v346_v24 = vsel %vm340_vm2, %v345_v22, %v338_v14  ;;  %v361_v27 = vstv %s552_s22  ;;  %v339_v28 = vsel %vm333_vm4, %v337_v19, 0.0  ;;  %p753_p3 = pnand %p752_p11, %p746_p4 }
  0x83   : > { %656 = vpow2.f32 %v308_v37  ;;  %v354_v26 = vsel %vm348_vm3, %v353_v25, %v346_v24  ;;  %v347_v32 = vsel %vm341_vm6, %v345_v22, %v339_v28 }
  0x84   : > { %658 = vpow2.f32 %v312_v38  ;;  %v362_v31 = vsel %vm356_vm5, %v361_v27, %v354_v26  ;;  %v355_v35 = vsel %vm349_vm7, %v353_v25, %v347_v32 }
  0x85   : > { %v363_v39 = vsel %vm357_vm8, %v361_v27, %v355_v35 }
  0x87   : > { %v645_v40 = vpop.eup %644 }
  0x88   : > { %v647_v41 = vpop.eup %646  ;;  %v314_v42 = vsel %vm275_vm0, %v645_v40, 0.0  ;;  %v392_v40 = vld [vmem:[%s1077_s8] sm:$0xff] }
  0x89   : > { %v649_v43 = vpop.eup %648  ;;  %v315_v44 = vsel %vm275_vm0, %v647_v41, 0.0 }
  0x8a   : > { %v651_v45 = vpop.eup %650  ;;  %v316_v46 = vadd.f32 %v315_v44, %v314_v42  ;;  %v317_v47 = vsel %vm275_vm0, %v649_v43, 0.0 }
  0x8b   : > { %v319_v48 = vsel %vm275_vm0, %v651_v45, 0.0  ;;  %v653_v51 = vpop.eup %652 }
  0x8c   : > { %v318_v49 = vadd.f32 %v317_v47, %v316_v46  ;;  %v655_v53 = vpop.eup %654  ;;  %v321_v55 = vsel %vm275_vm0, %v653_v51, 0.0  ;;  %v393_v46 = vld [vmem:[%s1077_s8 + $0x8] sm:$0xff] }
  0x8d   : > { %v657_v56 = vpop.eup %656  ;;  %v322_v58 = vsel %vm275_vm0, %v655_v53, 0.0 }
  0x8e   : > { %v320_v54 = vadd.f32 %v319_v48, %v318_v49  ;;  %v659_v59 = vpop.eup %658  ;;  %v323_v60 = vadd.f32 %v322_v58, %v321_v55  ;;  %v324_v61 = vsel %vm275_vm0, %v657_v56, 0.0 }
  0x8f   : > { %v326_v62 = vsel %vm275_vm0, %v659_v59, 0.0 }
  0x90   : > { %660 = vlog2.f32 %v320_v54  ;;  %v325_v63 = vadd.f32 %v324_v61, %v323_v60 }
  0x92   : > { %v327_v3 = vadd.f32 %v326_v62, %v325_v63 }
  0x94   : > { %662 = vlog2.f32 %v327_v3 }
  0x9a   : > { %v661_v8 = vpop.eup %660 }
  0x9b   : > { %v329_v9 = vmul.f32 0.6931472, %v661_v8 }
  0x9d   : > { %v366_v10 = vsub.f32 %v364_v2, %v329_v9 }
  0x9e   : > { %v663_v16 = vpop.eup %662 }
  0x9f   : > { %v368_v12 = vmax.f32 %v366_v10, -18.420681  ;;  %v331_v17 = vmul.f32 0.6931472, %v663_v16 }
  0xa1   : > { %v370_v15 = vmin.f32 %v368_v12, -1e-08  ;;  %v367_v13 = vsub.f32 %v365_v11, %v331_v17 }
  0xa3   : > { %v372_v18 = vmul.f32 1.442695, %v370_v15  ;;  %v369_v20 = vmax.f32 %v367_v13, -18.420681 }
  0xa5   : > { %664 = vpow2.f32 %v372_v18  ;;  %v371_v21 = vmin.f32 %v369_v20, -1e-08 }
  0xa7   : > { %v374_v23 = vmul.f32 1.442695, %v371_v21 }
  0xa9   : > { %666 = vpow2.f32 %v374_v23 }
  0xaf   : > { %v665_v29 = vpop.eup %664 }
  0xb0   : > { %v376_v30 = vsub.f32 1.0, %v665_v29 }
  0xb2   : > { %v378_v33 = vmul.f32 %v376_v30, %v376_v30 }
  0xb3   : > { %v667_v36 = vpop.eup %666 }
  0xb4   : > { %v380_v34 = vmul.f32 %v378_v33, %v362_v31  ;;  %v377_v38 = vsub.f32 1.0, %v667_v36 }
  0xb6   : > { %v382_v37 = vmul.f32 %v380_v34, %v370_v15  ;;  %v379_v42 = vmul.f32 %v377_v38, %v377_v38 }
  0xb8   : > { %v384_v41 = vsub.f32 0.0, %v382_v37  ;;  %v381_v44 = vmul.f32 %v379_v42, %v363_v39 }
  0xba   : > { %v394_v43 = vadd.f32 %v392_v40, %v384_v41  ;;  %v383_v45 = vmul.f32 %v381_v44, %v371_v21 }
  0xbc   : > { %396 = vst.msk [vmem:[%s1077_s8] sm:$0xff] %vm275_vm0, %v394_v43  ;;  %v385_v47 = vsub.f32 0.0, %v383_v45 }
  0xbe   : > { %v395_v48 = vadd.f32 %v393_v46, %v385_v47 }
  0xc0   : > { %397 = vst.msk [vmem:[%s1077_s8 + $0x8] sm:$0xff] %vm275_vm0, %v395_v48 }
  0xc1   : > { %756 = shalt.err (!%p753_p3)
}
  0xc2   : > { %s757_s30 = scalar_lea.hbm %s1199_s20, 256  ;;  %s761_s7 = scalar_lea.hbm %s1255_s3, 512 }
  0xc3   : > { %p758_p7 = scmp.ne.s32.totalorder %s1199_s20, %s757_s30  ;;  %p762_p8 = scmp.lt.u32.totalorder %s1199_s20, %s1255_s3 }
  0xc4   : > { %p763_p13 = scmp.lt.u32.totalorder %s761_s7, %s757_s30  ;;  %p765_p2 = scmp.lt.u32.totalorder %s757_s30, %s1199_s20 }
  0xc5   : > { %p759_p0 = pnand %p758_p7, %p1275_p6 }
  0xc6   : > { %p764_p12 = por %p763_p13, %p762_p8 }
  0xc7   : > { %p760_p1 = pneg %p759_p0 }
  0xc8   : > { %p766_p9 = por %p765_p2, %p764_p12 }
  0xca   : > { %p767_p4 = pnand %p766_p9, %p760_p1 }
  0xcc   : > { %770 = shalt.err (!%p767_p4)
}
  0xcd   : > { %s842_s23 = smov 128   ;;  %s843_s11 = smov 8  }
  0xce   : > { %569 = dma.vmem_to_hbm [thread:$0]  (%p1275_p6), %s1201_s10, 256, %s1199_s20, %s399_s27, %s842_s23, %s842_s23, %s843_s11  }
  0xcf PF: > { %s427_s22 = sand.u32 1, %s813_s12   ;;  %p1276_p10 = scmp.ne.s32.totalorder %s1266_s25, 0 }
  0xd0   : > { %p1277_p5 = scmp.ge.s32.totalorder %s833_s17, 2  ;;  %s428_s9 = scalar_lea.sflag [#allocation4], %s427_s22 }
  0xd2   : > { %p583_p11 = pnand %p1277_p5, %p1276_p10 }
  0xd4   : > { %808 = dma.done.wait (!%p583_p11), %s428_s9, 256  }
  0xd5   : > { %810 = vsyncadd (!%p583_p11), %s428_s9, 4294967040  ;;  %s23_s17 = sadd.s32 1, %s833_s17   ;;  %s1278_s12 = smov %s817_s13 }
  0xd6   : > { %p20_p3 = scmp.ge.s32.totalorder %s23_s17, 4   ;;  %s1279_s13 = smov %s821_s14 }
  0xd7   : > { %s1280_s14 = smov %s977_s28  ;;  %s1281_s15 = smov %s829_s16 }
  0xd8   : > { %s1282_s16 = smov %s1284_s5  ;;  %22 = sbr.rel (!%p20_p3) target bundleno = 12 (0xc), region = 99 }
  0xdf   :  { %433 = vsyncpa [#allocation3], 1 }
  0xe0   :  { %435 = vsyncpa [#allocation3 + $0x1], 1 }
  0xe1   :  { %436 = vsyncpa [#allocation7], 1 }
  0xe2   :  { %438 = vsyncpa [#allocation7 + $0x1], 1 }
  0xe3   :  { %439 = vsyncpa [#allocation4], 1 }
  0xe4   :  { %441 = vsyncpa [#allocation4 + $0x1], 1 }
  0xe5   :  { %442 = vsyncpa [#allocation5], 1 }
  0xe6   :  { %444 = vsyncpa [#allocation5 + $0x1], 1 }

</bundles_post_ra>
